<compile_context>
chip_gen: v7x
topology: tpu7x:2x2x1
jax: 0.10.0
libtpu: 0.0.40
codegen_flags: <defaults>
</compile_context>

<pallas_src>
import functools

import jax
import jax.numpy as jnp
from jax.experimental import pallas as pl
from jax.experimental.pallas import tpu as pltpu


_K_PAD = 8      # input features (3) padded to one sublane of feature-major x
_H_PAD = 128    # hidden (50) padded to one lane tile (MXU M dim)
_LANE = 128     # batch-tile granularity (lane width)


def _round_up(n, m):
    return ((n + m - 1) // m) * m


def _critic_kernel(xT_ref, w1T_ref, b1T_ref, w2T_ref, b2_ref, o_ref):
    x = xT_ref[...]                                   # (8, TB) f32, batch on lanes
    # x[x == 0] += 1  (zeros become 1; also neutralizes zero padding)
    x = jnp.where(x == 0.0, 1.0, x)
    # torch.log2 (EUP), fully lane-dense
    x = jnp.log2(x)
    # relu(Linear(3, 50)) on the MXU: (128, 8) @ (8, TB) -> (128, TB)
    h = jnp.dot(w1T_ref[...], x, preferred_element_type=jnp.float32)
    h = jnp.maximum(h + b1T_ref[...], 0.0)            # bias broadcast along lanes
    # Linear(50, 1): VPU multiply + sublane reduction -> lane-dense (1, TB) row.
    v = jnp.sum(h * w2T_ref[...], axis=0, keepdims=True) + b2_ref[0, 0]
    o_ref[...] = v                                    # (1, TB) unmasked lane store


def prepare_params(w1, b1, w2, b2):
    """Pad/transpose weights once, outside the per-call hot path."""
    d_in, d_hid = w1.shape
    w1T_p = jnp.zeros((_H_PAD, _K_PAD), jnp.float32).at[:d_hid, :d_in].set(w1.T)
    b1T_p = jnp.zeros((_H_PAD, 1), jnp.float32).at[:d_hid, 0].set(b1)
    w2T_p = jnp.zeros((_H_PAD, 1), jnp.float32).at[:d_hid, 0].set(w2[:, 0])
    b2_p = jnp.asarray(b2, jnp.float32).reshape(1, 1)
    return w1T_p, b1T_p, w2T_p, b2_p


@functools.partial(jax.jit, static_argnames=("tb",))
def critic_forward(x, w1T_p, b1T_p, w2T_p, b2_p, tb=8192):
    """x: (B, 3) float; returns (B, 1) float32."""
    B, d_in = x.shape

    # Lane-aligned batch tile, capped at the (padded) batch size.
    tb_eff = _round_up(min(tb, _round_up(B, _LANE)), _LANE)
    # Keep >= 2 grid steps when the batch is big enough so both v7x TCs get work.
    if B > 2 * _LANE and pl.cdiv(B, tb_eff) < 2:
        tb_eff = _round_up(pl.cdiv(B, 2), _LANE)
    n_steps = pl.cdiv(B, tb_eff)
    B_pad = n_steps * tb_eff

    # Single fused host pass: transpose to feature-major + pad (3 -> 8, B -> B_pad).
    xT = jnp.zeros((_K_PAD, B_pad), jnp.float32).at[:d_in, :B].set(
        x.astype(jnp.float32).T)

    cost = pl.CostEstimate(
        flops=2 * B_pad * _K_PAD * _H_PAD + 3 * B_pad * _H_PAD,
        transcendentals=B_pad * _K_PAD,
        bytes_accessed=B_pad * _K_PAD * 4 + B_pad * 4 + 2 * _K_PAD * _H_PAD * 4,
    )

    out_row = pl.pallas_call(
        _critic_kernel,
        out_shape=jax.ShapeDtypeStruct((1, B_pad), jnp.float32),
        grid=(n_steps,),
        in_specs=[
            pl.BlockSpec((_K_PAD, tb_eff), lambda i: (0, i)),     # x: batch on lanes
            pl.BlockSpec((_H_PAD, _K_PAD), lambda i: (0, 0)),     # w1^T: VMEM-resident
            pl.BlockSpec((_H_PAD, 1), lambda i: (0, 0)),          # b1 column
            pl.BlockSpec((_H_PAD, 1), lambda i: (0, 0)),          # w2 column
            pl.BlockSpec(memory_space=pltpu.MemorySpace.SMEM),    # b2 scalar in SMEM
        ],
        out_specs=pl.BlockSpec((1, tb_eff), lambda i: (0, i)),    # lane-dense row
        compiler_params=pltpu.CompilerParams(
            dimension_semantics=("parallel",),
            vmem_limit_bytes=32 * 1024 * 1024),
        cost_estimate=cost,
    )(xT, w1T_p, b1T_p, w2T_p, b2_p)

    return out_row[0, :B].reshape(B, 1)


def init_params(input_size=3, hidden=50, key=jax.random.PRNGKey(0)):
    """Deterministic synthetic parameters (PyTorch Linear-style init bounds)."""
    k1, k2, k3, k4 = jax.random.split(key, 4)
    bound1 = 1.0 / jnp.sqrt(input_size)
    w1 = jax.random.uniform(k1, (input_size, hidden), jnp.float32, -bound1, bound1)
    b1 = jax.random.uniform(k2, (hidden,), jnp.float32, -bound1, bound1)
    bound2 = 1.0 / jnp.sqrt(hidden)
    w2 = jax.random.uniform(k3, (hidden, 1), jnp.float32, -bound2, bound2)
    b2 = jax.random.uniform(k4, (1,), jnp.float32, -bound2, bound2)
    return w1, b1, w2, b2


def reference_forward(x, w1, b1, w2, b2):
    """Plain-JAX reference implementing the same PyTorch semantics."""
    x = jnp.where(x == 0.0, 1.0, x)
    x = jnp.log2(x)
    h = jnp.maximum(x @ w1 + b1, 0.0)
    return h @ w2 + b2


if __name__ == "__main__":
    key = jax.random.PRNGKey(0)
    k_small, k_big, k_params = jax.random.split(key, 3)

    B, input_size = 8, 3
    # Positive inputs plus a few exact zeros to exercise the x==0 -> 1 rule.
    x = jax.random.uniform(k_small, (B, input_size), jnp.float32, 0.5, 4.0)
    x = x.at[0, 1].set(0.0).at[3, 2].set(0.0)

    w1, b1, w2, b2 = init_params(input_size=input_size, key=k_params)
    w1T_p, b1T_p, w2T_p, b2_p = prepare_params(w1, b1, w2, b2)

    v = jax.block_until_ready(critic_forward(x, w1T_p, b1T_p, w2T_p, b2_p))
    v_ref = reference_forward(x, w1, b1, w2, b2)
    assert v.shape == (B, 1)
    assert jnp.allclose(v, v_ref, atol=1e-5, rtol=1e-5), (v, v_ref)

    # Exercise the multi-step batch grid + partial-final-tile padding path.
    B2 = 300
    x2 = jax.random.uniform(k_big, (B2, input_size), jnp.float32, 0.5, 4.0)
    x2 = x2.at[17, 0].set(0.0)
    v2 = jax.block_until_ready(
        critic_forward(x2, w1T_p, b1T_p, w2T_p, b2_p, tb=128))
    v2_ref = reference_forward(x2, w1, b1, w2, b2)
    assert v2.shape == (B2, 1)
    assert jnp.allclose(v2, v2_ref, atol=1e-5, rtol=1e-5)

    # Default large tile: mid-size batch is auto-split into >=2 parallel steps.
    v3 = jax.block_until_ready(critic_forward(x2, w1T_p, b1T_p, w2T_p, b2_p))
    assert jnp.allclose(v3, v2_ref, atol=1e-5, rtol=1e-5)

    print("KERNEL_OK")
</pallas_src>

<mosaic_0001>
module attributes {stable_mosaic.version = 11 : i64} {
  func.func @_critic_kernel(%arg0: i32, %arg1: memref<8x128xf32, #tpu.memory_space<vmem>>, %arg2: memref<128x8xf32, #tpu.memory_space<vmem>>, %arg3: memref<128x1xf32, #tpu.memory_space<vmem>>, %arg4: memref<128x1xf32, #tpu.memory_space<vmem>>, %arg5: memref<1x1xf32, #tpu.memory_space<smem>>, %arg6: memref<1x128xf32, #tpu.memory_space<vmem>>) attributes {dimension_semantics = [#tpu.dimension_semantics<parallel>], iteration_bounds = array<i64: 1>, scalar_prefetch = 0 : i64, scratch_operands = 0 : i64, tpu.core_type = #tpu.core_type<tc>, window_params = [{transform_indices = @transform_0, window_bounds = array<i64: 8, 128>}, {pipeline_mode = #tpu.pipeline_mode<synchronous>, transform_indices = @transform_1, window_bounds = array<i64: 128, 8>}, {pipeline_mode = #tpu.pipeline_mode<synchronous>, transform_indices = @transform_2, window_bounds = array<i64: 128, 1>}, {pipeline_mode = #tpu.pipeline_mode<synchronous>, transform_indices = @transform_3, window_bounds = array<i64: 128, 1>}, {transform_indices = @transform_4, window_bounds = array<i64: 1, 1>}, {transform_indices = @transform_5, window_bounds = array<i64: 1, 128>}]} {
    %c0 = arith.constant 0 : index
    %c0_0 = arith.constant 0 : index
    %0 = vector.load %arg1[%c0, %c0_0] : memref<8x128xf32, #tpu.memory_space<vmem>>, vector<8x128xf32>
    %cst = arith.constant 0.000000e+00 : f32
    %1 = vector.broadcast %cst : f32 to vector<8x128xf32>
    %2 = arith.cmpf oeq, %0, %1 : vector<8x128xf32>
    %cst_1 = arith.constant 1.000000e+00 : f32
    %3 = vector.broadcast %cst_1 : f32 to vector<8x128xf32>
    %4 = arith.select %2, %3, %0 : vector<8x128xi1>, vector<8x128xf32>
    %5 = math.log %4 : vector<8x128xf32>
    %cst_2 = arith.constant 2.000000e+00 : f32
    %6 = math.log %cst_2 : f32
    %7 = vector.broadcast %6 : f32 to vector<8x128xf32>
    %8 = arith.divf %5, %7 : vector<8x128xf32>
    %c0_3 = arith.constant 0 : index
    %c0_4 = arith.constant 0 : index
    %9 = vector.load %arg2[%c0_3, %c0_4] : memref<128x8xf32, #tpu.memory_space<vmem>>, vector<128x8xf32>
    %cst_5 = arith.constant dense<0.000000e+00> : vector<128x128xf32>
    %10 = tpu.matmul %9, %8, %cst_5 {dimension_numbers = #tpu.dot_dimension_numbers<[1], [0], [0], [1], [0, 0, 1, 1], [], []>} : vector<128x8xf32>, vector<8x128xf32>, vector<128x128xf32> -> vector<128x128xf32>
    %c0_6 = arith.constant 0 : index
    %c0_7 = arith.constant 0 : index
    %11 = vector.load %arg3[%c0_6, %c0_7] : memref<128x1xf32, #tpu.memory_space<vmem>>, vector<128x1xf32>
    %12 = vector.broadcast %11 : vector<128x1xf32> to vector<128x128xf32>
    %13 = arith.addf %10, %12 : vector<128x128xf32>
    %cst_8 = arith.constant 0.000000e+00 : f32
    %14 = vector.broadcast %cst_8 : f32 to vector<128x128xf32>
    %15 = arith.maximumf %13, %14 : vector<128x128xf32>
    %c0_9 = arith.constant 0 : index
    %c0_10 = arith.constant 0 : index
    %16 = vector.load %arg4[%c0_9, %c0_10] : memref<128x1xf32, #tpu.memory_space<vmem>>, vector<128x1xf32>
    %17 = vector.broadcast %16 : vector<128x1xf32> to vector<128x128xf32>
    %18 = arith.mulf %15, %17 : vector<128x128xf32>
    %cst_11 = arith.constant dense<0.000000e+00> : vector<128xf32>
    %19 = vector.multi_reduction <add>, %18, %cst_11 [0] : vector<128x128xf32> to vector<128xf32>
    %20 = vector.shape_cast %19 : vector<128xf32> to vector<1x128xf32>
    %c0_12 = arith.constant 0 : index
    %c0_13 = arith.constant 0 : index
    %21 = memref.load %arg5[%c0_12, %c0_13] : memref<1x1xf32, #tpu.memory_space<smem>>
    %22 = vector.broadcast %21 : f32 to vector<1x128xf32>
    %23 = arith.addf %20, %22 : vector<1x128xf32>
    %c0_14 = arith.constant 0 : index
    %c0_15 = arith.constant 0 : index
    %24 = vector.load %arg6[%c0_14, %c0_15] : memref<1x128xf32, #tpu.memory_space<vmem>>, vector<1x128xf32>
    tpu.vector_store %arg6[%c0_14, %c0_15], %23 {strides = array<i32>} : memref<1x128xf32, #tpu.memory_space<vmem>>, vector<1x128xf32>,
    return
  }
  func.func @transform_0(%arg0: i32) -> (i32, i32) {
    %c0_i32 = arith.constant 0 : i32
    %c0_i32_0 = arith.constant 0 : i32
    return %c0_i32, %arg0 : i32, i32
  }
  func.func @transform_1(%arg0: i32) -> (i32, i32) {
    %c0_i32 = arith.constant 0 : i32
    %c0_i32_0 = arith.constant 0 : i32
    %c0_i32_1 = arith.constant 0 : i32
    return %c0_i32, %c0_i32_0 : i32, i32
  }
  func.func @transform_2(%arg0: i32) -> (i32, i32) {
    %c0_i32 = arith.constant 0 : i32
    %c0_i32_0 = arith.constant 0 : i32
    %c0_i32_1 = arith.constant 0 : i32
    return %c0_i32, %c0_i32_0 : i32, i32
  }
  func.func @transform_3(%arg0: i32) -> (i32, i32) {
    %c0_i32 = arith.constant 0 : i32
    %c0_i32_0 = arith.constant 0 : i32
    %c0_i32_1 = arith.constant 0 : i32
    return %c0_i32, %c0_i32_0 : i32, i32
  }
  func.func @transform_4(%arg0: i32) -> (i32, i32) {
    %c0_i32 = arith.constant 0 : i32
    %c0_i32_0 = arith.constant 0 : i32
    %c0_i32_1 = arith.constant 0 : i32
    return %c0_i32, %c0_i32_0 : i32, i32
  }
  func.func @transform_5(%arg0: i32) -> (i32, i32) {
    %c0_i32 = arith.constant 0 : i32
    %c0_i32_0 = arith.constant 0 : i32
    return %c0_i32, %arg0 : i32, i32
  }
}

</mosaic_0001>

<bundles_post_ra>
// kernel: critic_forward.1
= control target key start
LH: loop header
LB: loop body
LE: loop exit
PB: predicated region body
PF: predicated region fallthrough
CT: control target
= control target key end

     0   :  { %vm140_vm0 = vcmask 64512   ;;  %v557_v0 = vmov 0   ;;  %s757_s2 = inlined_call_operand.vmem [shape: f32[128,1], index: 2, kind: input, shape index: {}]   ;;  %s758_s0 = inlined_call_operand.vmem [shape: f32[8,128], index: 0, kind: input, shape index: {}]   ;;  %s759_s1 = inlined_call_operand.vmem [shape: f32[128,8], index: 1, kind: input, shape index: {}]   ;;  %s760_s3 = inlined_call_operand.vmem [shape: f32[128,1], index: 3, kind: input, shape index: {}]   ;;  %s761_s4 = inlined_call_operand.<no memory space> [shape: f32[1,1], index: 4, kind: input, shape index: {}]   ;;  %s762_s5 = inlined_call_operand.vmem [shape: f32[1,128], index: 5, kind: output, shape index: {}]  }
   0x1   :  { %553 = vset.pattern.permute.xlu0 %v557_v0  ;;  %v44_v1 = vld [vmem:[%s757_s2] sm:$0xff]  ;;  %554 = vset.pattern.permute.xlu1 %v557_v0  ;;  %v46_v3 = vld [vmem:[%s757_s2 + $0x10] sm:$0xff]  ;;  %v45_v7 = vld [vmem:[%s757_s2 + $0x8] sm:$0xff] }
   0x2   :  { %v21_v2 = vld [vmem:[%s758_s0] sm:$0xff]  ;;  %62 = vperm.xlu0 %553, %v44_v1   ;;  %72 = vperm.xlu1 %554, %v46_v3   ;;  %v47_v8 = vld [vmem:[%s757_s2 + $0x18] sm:$0xff]  ;;  %v351_v11 = vld [vmem:[%s760_s3 + $0x8] sm:$0xff] }
   0x3   :  { %vm22_vm1 = vcmp.eq.f32.partialorder %v21_v2, 0.0  ;;  %v28_v4 = vld [vmem:[%s759_s1] sm:$0xff]  ;;  %v352_v12 = vld [vmem:[%s760_s3 + $0x10] sm:$0xff]  ;;  %v49_v15 = vld [vmem:[%s757_s2 + $0x28] sm:$0xff] }
   0x4   :  { %v36_v5 = vld [vmem:[%s759_s1 + $0x40] sm:$0xff]  ;;  %v23_v6 = vsel %vm22_vm1, 1.0, %v21_v2  ;;  %526 = vmatprep.mubr.msk.f32.mxu0 %vm140_vm0, %v28_v4  ;;  %v353_v16 = vld [vmem:[%s760_s3 + $0x18] sm:$0xff]  ;;  %v29_v18 = vld [vmem:[%s759_s1 + $0x8] sm:$0xff] }
   0x5   :  { %538 = vmatprep.mubr.msk.f32.mxu1 %vm140_vm0, %v36_v5  ;;  %555 = vlog2.f32 %v23_v6  ;;  %v48_v9 = vld [vmem:[%s757_s2 + $0x20] sm:$0xff]  ;;  %v37_v19 = vld [vmem:[%s759_s1 + $0x48] sm:$0xff]  ;;  %v30_v20 = vld [vmem:[%s759_s1 + $0x10] sm:$0xff] }
   0x6   :  { %67 = vperm.xlu0 %553, %v45_v7   ;;  %77 = vperm.xlu1 %554, %v47_v8   ;;  %v350_v10 = vld [vmem:[%s760_s3] sm:$0xff]  ;;  %v38_v21 = vld [vmem:[%s759_s1 + $0x50] sm:$0xff]  ;;  %v31_v24 = vld [vmem:[%s759_s1 + $0x18] sm:$0xff] }
   0x7   :  { %v50_v22 = vld [vmem:[%s757_s2 + $0x30] sm:$0xff]  ;;  %v354_v23 = vld [vmem:[%s760_s3 + $0x20] sm:$0xff]  ;;  %v39_v25 = vld [vmem:[%s759_s1 + $0x58] sm:$0xff] }
   0x8   :  { %v32_v26 = vld [vmem:[%s759_s1 + $0x20] sm:$0xff]  ;;  %v51_v28 = vld [vmem:[%s757_s2 + $0x38] sm:$0xff]  ;;  %v355_v29 = vld [vmem:[%s760_s3 + $0x28] sm:$0xff] }
   0x9   :  { %v40_v27 = vld [vmem:[%s759_s1 + $0x60] sm:$0xff]  ;;  %v33_v30 = vld [vmem:[%s759_s1 + $0x28] sm:$0xff]  ;;  %v34_v32 = vld [vmem:[%s759_s1 + $0x30] sm:$0xff] }
   0xa   :  { %82 = vperm.xlu0 %553, %v48_v9   ;;  %368 = vperm.xlu1 %554, %v350_v10   ;;  %v41_v31 = vld [vmem:[%s759_s1 + $0x68] sm:$0xff]  ;;  %v42_v33 = vld [vmem:[%s759_s1 + $0x70] sm:$0xff]  ;;  %v52_v34 = vld [vmem:[%s757_s2 + $0x40] sm:$0xff] }
   0xb   :  { %v356_v35 = vld [vmem:[%s760_s3 + $0x30] sm:$0xff]  ;;  %v35_v36 = vld [vmem:[%s759_s1 + $0x38] sm:$0xff]  ;;  %v53_v38 = vld [vmem:[%s757_s2 + $0x48] sm:$0xff] }
   0xc   :  { %v43_v37 = vld [vmem:[%s759_s1 + $0x78] sm:$0xff]  ;;  %v54_v40 = vld [vmem:[%s757_s2 + $0x50] sm:$0xff]  ;;  %v358_v41 = vld [vmem:[%s760_s3 + $0x40] sm:$0xff] }
   0xd   :  { %v357_v39 = vld [vmem:[%s760_s3 + $0x38] sm:$0xff]  ;;  %v359_v43 = vld [vmem:[%s760_s3 + $0x48] sm:$0xff]  ;;  %v56_v44 = vld [vmem:[%s757_s2 + $0x60] sm:$0xff] }
   0xe   :  { %373 = vperm.xlu0 %553, %v351_v11   ;;  %378 = vperm.xlu1 %554, %v352_v12   ;;  %v55_v42 = vld [vmem:[%s757_s2 + $0x58] sm:$0xff]  ;;  %v360_v45 = vld [vmem:[%s760_s3 + $0x50] sm:$0xff]  ;;  %v57_v46 = vld [vmem:[%s757_s2 + $0x68] sm:$0xff] }
   0xf   :  { %v556_v13 = vpop.eup %555  ;;  %v361_v47 = vld [vmem:[%s760_s3 + $0x58] sm:$0xff]  ;;  %v58_v48 = vld [vmem:[%s757_s2 + $0x70] sm:$0xff]  ;;  %v362_v49 = vld [vmem:[%s760_s3 + $0x60] sm:$0xff] }
  0x10   :  { %v25_v14 = vmul.f32 0.6931472, %v556_v13  ;;  %v59_v50 = vld [vmem:[%s757_s2 + $0x78] sm:$0xff]  ;;  %v363_v51 = vld [vmem:[%s760_s3 + $0x68] sm:$0xff]  ;;  %v364_v52 = vld [vmem:[%s760_s3 + $0x70] sm:$0xff] }
  0x11   :  { %v365_v53 = vld [vmem:[%s760_s3 + $0x78] sm:$0xff] }
  0x12   :  { %v27_v17 = vmul.f32 1.442695, %v25_v14  ;;  %87 = vperm.xlu0 %553, %v49_v15   ;;  %383 = vperm.xlu1 %554, %v353_v16  }
  0x14   :  { %524 = vmatprep.subr.mxu0 %v27_v17  ;;  %550 = vmatprep.subr.mxu1 %v27_v17 }
  0x15   :  { %525 = vmatpush3.msra.mxu0 %v27_v17  ;;  %551 = vmatpush3.msra.mxu1 %v27_v17 }
  0x16   :  { %527 = vmatmul.mubr.msk.f32.vlgmr.msra.gmra.mrb[0].mxu0 %vm140_vm0, %v29_v18  ;;  %539 = vmatmul.mubr.msk.f32.vlgmr.msra.gmra.mrb[0].mxu1 %vm140_vm0, %v37_v19 }
  0x17   :  { %529 = vmatprep.mubr.msk.f32.mxu0 %vm140_vm0, %v30_v20  ;;  %541 = vmatprep.mubr.msk.f32.mxu1 %vm140_vm0, %v38_v21 }
  0x18   :  { %92 = vperm.xlu0 %553, %v50_v22   ;;  %388 = vperm.xlu1 %554, %v354_v23  }
  0x1a   :  { %530 = vmatmul.mubr.msk.f32.gmra.mrb[2].mxu0 %vm140_vm0, %v31_v24  ;;  %542 = vmatmul.mubr.msk.f32.gmra.mrb[2].mxu1 %vm140_vm0, %v39_v25 }
  0x1b   :  { %532 = vmatprep.mubr.msk.f32.mxu0 %vm140_vm0, %v32_v26  ;;  %544 = vmatprep.mubr.msk.f32.mxu1 %vm140_vm0, %v40_v27 }
  0x1c   :  { %97 = vperm.xlu0 %553, %v51_v28   ;;  %393 = vperm.xlu1 %554, %v355_v29  }
  0x1e   :  { %533 = vmatmul.mubr.msk.f32.gmra.mrb[4].mxu0 %vm140_vm0, %v33_v30  ;;  %545 = vmatmul.mubr.msk.f32.gmra.mrb[4].mxu1 %vm140_vm0, %v41_v31 }
  0x1f   :  { %535 = vmatprep.mubr.msk.f32.mxu0 %vm140_vm0, %v34_v32  ;;  %547 = vmatprep.mubr.msk.f32.mxu1 %vm140_vm0, %v42_v33 }
  0x20   :  { %102 = vperm.xlu0 %553, %v52_v34   ;;  %398 = vperm.xlu1 %554, %v356_v35  }
  0x22   :  { %536 = vmatmul.mubr.msk.f32.gmra.mrb[6].mxu0 %vm140_vm0, %v35_v36  ;;  %548 = vmatmul.mubr.msk.f32.gmra.mrb[6].mxu1 %vm140_vm0, %v43_v37 }
  0x24   :  { %107 = vperm.xlu0 %553, %v53_v38   ;;  %403 = vperm.xlu1 %554, %v357_v39  }
  0x28   :  { %112 = vperm.xlu0 %553, %v54_v40   ;;  %408 = vperm.xlu1 %554, %v358_v41  }
  0x2c   :  { %117 = vperm.xlu0 %553, %v55_v42   ;;  %413 = vperm.xlu1 %554, %v359_v43  }
  0x30   :  { %122 = vperm.xlu0 %553, %v56_v44   ;;  %418 = vperm.xlu1 %554, %v360_v45  }
  0x34   :  { %127 = vperm.xlu0 %553, %v57_v46   ;;  %423 = vperm.xlu1 %554, %v361_v47  }
  0x38   :  { %132 = vperm.xlu0 %553, %v58_v48   ;;  %428 = vperm.xlu1 %554, %v362_v49  }
  0x3c   :  { %137 = vperm.xlu0 %553, %v59_v50   ;;  %433 = vperm.xlu1 %554, %v363_v51  }
  0x40   :  { %438 = vperm.xlu0 %553, %v364_v52   ;;  %443 = vperm.xlu1 %554, %v365_v53  }
  0x81   :  { %v63_v54 = vpop.permute.xlu0 %62  ;;  %v73_v55 = vpop.permute.xlu1 %72 }
  0x85   :  { %v68_v56 = vpop.permute.xlu0 %67  ;;  %v78_v57 = vpop.permute.xlu1 %77 }
  0x89   :  { %v83_v58 = vpop.permute.xlu0 %82  ;;  %v369_v59 = vpop.permute.xlu1 %368 }
  0x8d   :  { %v374_v60 = vpop.permute.xlu0 %373  ;;  %v379_v61 = vpop.permute.xlu1 %378 }
  0x91   :  { %v88_v62 = vpop.permute.xlu0 %87  ;;  %v384_v63 = vpop.permute.xlu1 %383 }
  0x97   :  { %v93_v0 = vpop.permute.xlu0 %92  ;;  %v389_v1 = vpop.permute.xlu1 %388 }
  0x9b   :  { %v98_v2 = vpop.permute.xlu0 %97  ;;  %v394_v3 = vpop.permute.xlu1 %393 }
  0x9f   :  { %v103_v4 = vpop.permute.xlu0 %102  ;;  %v399_v5 = vpop.permute.xlu1 %398 }
  0xa3   :  { %v108_v6 = vpop.permute.xlu0 %107  ;;  %v404_v7 = vpop.permute.xlu1 %403 }
  0xa7   :  { %v113_v8 = vpop.permute.xlu0 %112  ;;  %v409_v9 = vpop.permute.xlu1 %408 }
  0xab   :  { %v118_v10 = vpop.permute.xlu0 %117  ;;  %v414_v17 = vpop.permute.xlu1 %413 }
  0xaf   :  { %v123_v28 = vpop.permute.xlu0 %122  ;;  %v419_v39 = vpop.permute.xlu1 %418 }
  0xb3   :  { %v128_v53 = vpop.permute.xlu0 %127 }
  0xe9   :  { %v528_v11 = vpop.f32.mrb[0].mxu0  ;;  %v540_v12 = vpop.f32.mrb[0].mxu1 }
  0xea   :  { %v261_v13 = vadd.f32 %v528_v11, %v68_v56  ;;  %v255_v14 = vpop.f32.mrb[1].mxu0  ;;  %v295_v15 = vpop.f32.mrb[1].mxu1 }
  0xeb   :  { %v256_v16 = vadd.f32 %v255_v14, %v63_v54  ;;  %v296_v49 = vadd.f32 %v295_v15, %v103_v4  ;;  %v301_v54 = vadd.f32 %v540_v12, %v108_v6 }
  0xec   :  { %v335_v18 = vmax.f32 %v261_v13, 0.0 }
  0xed   :  { %v334_v19 = vmax.f32 %v256_v16, 0.0  ;;  %v531_v20 = vpop.f32.mrb[2].mxu0  ;;  %v543_v21 = vpop.f32.mrb[2].mxu1  ;;  %v343_v11 = vmax.f32 %v301_v54, 0.0 }
  0xee   :  { %v447_v22 = vmul.f32 %v374_v60, %v335_v18  ;;  %v271_v23 = vadd.f32 %v531_v20, %v78_v57  ;;  %v265_v24 = vpop.f32.mrb[3].mxu0  ;;  %v305_v25 = vpop.f32.mrb[3].mxu1  ;;  %v342_v60 = vmax.f32 %v296_v49, 0.0  ;;  %v311_v13 = vadd.f32 %v543_v21, %v118_v10 }
  0xef   :  { %v446_v26 = vmul.f32 %v369_v59, %v334_v19  ;;  %v266_v27 = vadd.f32 %v265_v24, %v73_v55  ;;  %v424_v59 = vpop.permute.xlu1 %423  ;;  %v133_v16 = vpop.permute.xlu0 %132  ;;  %v455_v6 = vmul.f32 %v414_v17, %v343_v11 }
  0xf0   :  { %v337_v30 = vmax.f32 %v271_v23, 0.0  ;;  %v454_v4 = vmul.f32 %v409_v9, %v342_v60 }
  0xf1   :  { %v462_v29 = vadd.f32 %v447_v22, %v446_v26  ;;  %v336_v31 = vmax.f32 %v266_v27, 0.0  ;;  %v534_v32 = vpop.f32.mrb[4].mxu0  ;;  %v546_v33 = vpop.f32.mrb[4].mxu1 }
  0xf2   :  { %v281_v34 = vadd.f32 %v534_v32, %v88_v62  ;;  %v275_v35 = vpop.f32.mrb[5].mxu0  ;;  %v315_v36 = vpop.f32.mrb[5].mxu1  ;;  %v449_v40 = vmul.f32 %v384_v63, %v337_v30  ;;  %v321_v12 = vadd.f32 %v546_v33, %v128_v53 }
  0xf3   :  { %v448_v37 = vmul.f32 %v379_v61, %v336_v31  ;;  %v276_v38 = vadd.f32 %v275_v35, %v83_v58  ;;  %v306_v61 = vadd.f32 %v305_v25, %v113_v8  ;;  %v316_v15 = vadd.f32 %v315_v36, %v123_v28  ;;  %v429_v18 = vpop.permute.xlu1 %428 }
  0xf4   :  { %v339_v42 = vmax.f32 %v281_v34, 0.0  ;;  %v347_v25 = vmax.f32 %v321_v12, 0.0 }
  0xf5   :  { %v463_v41 = vadd.f32 %v462_v29, %v448_v37  ;;  %v338_v43 = vmax.f32 %v276_v38, 0.0  ;;  %v537_v44 = vpop.f32.mrb[6].mxu0  ;;  %v549_v45 = vpop.f32.mrb[6].mxu1  ;;  %v346_v22 = vmax.f32 %v316_v15, 0.0 }
  0xf6   :  { %v291_v46 = vadd.f32 %v537_v44, %v98_v2  ;;  %v285_v47 = vpop.f32.mrb[7].mxu0  ;;  %v325_v48 = vpop.f32.mrb[7].mxu1  ;;  %v451_v55 = vmul.f32 %v394_v3, %v339_v42  ;;  %v345_v3 = vmax.f32 %v311_v13, 0.0  ;;  %v484_v42 = vstv %s761_s4 }
  0xf7   :  { %v450_v50 = vmul.f32 %v389_v1, %v338_v43  ;;  %v464_v51 = vadd.f32 %v463_v41, %v449_v40  ;;  %v286_v52 = vadd.f32 %v285_v47, %v93_v0  ;;  %v344_v1 = vmax.f32 %v306_v61, 0.0  ;;  %v434_v21 = vpop.permute.xlu1 %433 }
  0xf8   :  { %v341_v57 = vmax.f32 %v291_v46, 0.0  ;;  %v326_v8 = vadd.f32 %v325_v48, %v133_v16  ;;  %v457_v24 = vmul.f32 %v424_v59, %v345_v3  ;;  %v458_v26 = vmul.f32 %v429_v18, %v346_v22 }
  0xf9   :  { %v465_v56 = vadd.f32 %v464_v51, %v450_v50  ;;  %v340_v58 = vmax.f32 %v286_v52, 0.0  ;;  %v456_v20 = vmul.f32 %v419_v39, %v344_v1  ;;  %v459_v28 = vmul.f32 %v434_v21, %v347_v25 }
  0xfa   :  { %v453_v2 = vmul.f32 %v404_v7, %v341_v57  ;;  %v348_v9 = vmax.f32 %v326_v8, 0.0 }
  0xfb   :  { %v452_v62 = vmul.f32 %v399_v5, %v340_v58  ;;  %v466_v63 = vadd.f32 %v465_v56, %v451_v55  ;;  %v138_v5 = vpop.permute.xlu0 %137  ;;  %v444_v33 = vpop.permute.xlu1 %443 }
  0xfc   :  { %v331_v10 = vadd.f32 %v549_v45, %v138_v5 }
  0xfd   :  { %v467_v14 = vadd.f32 %v466_v63, %v452_v62 }
  0xfe   :  { %v349_v29 = vmax.f32 %v331_v10, 0.0 }
  0xff   :  { %v468_v0 = vadd.f32 %v467_v14, %v453_v2  ;;  %v439_v17 = vpop.permute.xlu0 %438 }
 0x100   :  { %v460_v31 = vmul.f32 %v439_v17, %v348_v9  ;;  %v461_v34 = vmul.f32 %v444_v33, %v349_v29 }
 0x101   :  { %v469_v19 = vadd.f32 %v468_v0, %v454_v4 }
 0x103   :  { %v470_v23 = vadd.f32 %v469_v19, %v455_v6 }
 0x105   :  { %v471_v7 = vadd.f32 %v470_v23, %v456_v20 }
 0x107   :  { %v472_v27 = vadd.f32 %v471_v7, %v457_v24 }
 0x109   :  { %v473_v30 = vadd.f32 %v472_v27, %v458_v26 }
 0x10b   :  { %v474_v32 = vadd.f32 %v473_v30, %v459_v28 }
 0x10d   :  { %v475_v35 = vadd.f32 %v474_v32, %v460_v31 }
 0x10f   :  { %v476_v36 = vadd.f32 %v475_v35, %v461_v34 }
 0x111   :  { %v477_v37 = vrot.slane %v476_v36, 4 }
 0x113   :  { %v478_v38 = vadd.f32 %v477_v37, %v476_v36 }
 0x115   :  { %v479_v39 = vrot.slane %v478_v38, 2 }
 0x117   :  { %v480_v40 = vadd.f32 %v479_v39, %v478_v38 }
 0x119   :  { %v481_v41 = vrot.slane %v480_v40, 1 }
 0x11b   :  { %v482_v43 = vadd.f32 %v481_v41, %v480_v40 }
 0x11d   :  { %v485_v44 = vadd.f32 %v484_v42, %v482_v43 }
 0x11f   :  { %486 = vst [vmem:[%s762_s5] sm:$0x1] %v485_v44 }

</bundles_post_ra>
